<compile_context>
chip_gen: v6e
topology: v6e:2x2x1
jax: 0.10.0
libtpu: 0.0.40
codegen_flags: <defaults>
</compile_context>

<pallas_src>
import math

import jax
import jax.numpy as jnp
from jax.experimental import pallas as pl
from jax.experimental.pallas import tpu as pltpu


_LANE = 128
_SMALL_PROBLEM_BYTES = 256 * 1024          # below this, plain XLA is faster
_TARGET_BLOCK_BYTES = 4 * 1024 * 1024      # ~4 MiB x-block per grid step
_MIN_VMEM_BYTES = 16 * 1024 * 1024
_MAX_VMEM_BYTES = 32 * 1024 * 1024         # safe on v5e/v6e (128 MiB) and v7x (64 MiB)


def _threshold_kernel(k_ref, x_ref, t_ref, o_ref):
    # k_ref: (1, 1) SMEM scalar
    # x_ref: (TB, TF) lane-dense input block
    # t_ref: (1, TF) thresh block (broadcasts over the batch sublanes)
    k = k_ref[0, 0]
    x = x_ref[...].astype(jnp.float32)
    t = t_ref[...].astype(jnp.float32)
    o_ref[...] = jax.nn.sigmoid((x - t) * k).astype(o_ref.dtype)


def _sublane(itemsize):
    # Sub-32-bit dtypes pack along sublanes: bf16 vreg is [16,128], int8/fp8 [32,128].
    return {4: 8, 2: 16, 1: 32}.get(itemsize, 8)


def _round_up(v, m):
    return -(-v // m) * m


def _pick_tiles(batch, feat, itemsize, target_bytes=_TARGET_BLOCK_BYTES):
    """Pick (TB, TF) for a (batch, feat) lane-dense elementwise problem."""
    sub = _sublane(itemsize)
    row_bytes = feat * itemsize

    if sub * row_bytes > target_bytes:
        # Feature-axis tiling fallback for very wide rows: keep the pipeline
        # at full depth with a 128-multiple lane tile.
        tb = batch if batch <= sub else sub
        tf = max(_LANE, (target_bytes // (max(tb, 1) * itemsize)) // _LANE * _LANE)
        tf = min(tf, feat)
        return tb, tf

    tf = feat
    tb = max(sub, (target_bytes // max(row_bytes, 1)) // sub * sub)
    if tb >= batch:
        if batch > sub:
            # Keep >= 2 batch blocks so the "parallel" axis can shard across
            # both TensorCores on v7x.
            tb = min(_round_up((batch + 1) // 2, sub), batch)
        else:
            tb = batch  # full-dim block: always legal regardless of (8,128)
    return tb, tf


def _fold_factor(batch, feat):
    """Smallest g with (g*feat) % 128 == 0 and batch % g == 0, else None."""
    g = _LANE // math.gcd(feat, _LANE)
    if g == 1:
        return 1
    if g <= batch and batch % g == 0:
        return g
    return None


def threshold_forward(x, thresh, k=1.0, *, force_pallas=False):
    """sigmoid((x - thresh) * k) with thresh broadcast over the batch axis."""
    B, num_rules, num_otus = x.shape
    assert thresh.shape == (num_rules, num_otus)
    F = num_rules * num_otus
    itemsize = jnp.dtype(x.dtype).itemsize

    if not force_pallas and B * F * itemsize <= _SMALL_PROBLEM_BYTES:
        # Small-problem bypass: fixed pallas_call + grid-step overhead would
        # dominate; plain XLA fusion is faster.
        return jax.nn.sigmoid((x - thresh[None, :, :]) * k).astype(x.dtype)

    t_flat = thresh.reshape(1, F)
    g = _fold_factor(B, F)
    if g is not None:
        # Fold g batch rows into the lane axis: free reshape on x, tiny tile
        # on thresh, stores become unmasked 128-multiples.
        Beff, Feff = B // g, g * F
        x2 = x.reshape(Beff, Feff)
        t2 = jnp.tile(t_flat, (1, g)) if g > 1 else t_flat
        pad = 0
    else:
        # Pad the feature axis up to the next 128-multiple; slice on return.
        Beff = B
        Feff = _round_up(F, _LANE)
        pad = Feff - F
        x2 = x.reshape(B, F)
        t2 = t_flat
        if pad:
            x2 = jnp.pad(x2, ((0, 0), (0, pad)))
            t2 = jnp.pad(t2, ((0, 0), (0, pad)))

    TB, TF = _pick_tiles(Beff, Feff, itemsize)
    grid = (pl.cdiv(Beff, TB), pl.cdiv(Feff, TF))

    # 2x double-buffered x blocks + 2x double-buffered out blocks + thresh tile
    # + headroom, clamped to a range that is safe on every generation.
    block_bytes = TB * TF * itemsize
    vmem_limit = 4 * block_bytes + 2 * TF * itemsize + (2 << 20)
    vmem_limit = int(min(_MAX_VMEM_BYTES, max(_MIN_VMEM_BYTES, vmem_limit)))

    # k as an SMEM scalar: works with traced k, no recompile per value.
    k_arr = jnp.asarray(k, dtype=jnp.float32).reshape(1, 1)

    out2 = pl.pallas_call(
        _threshold_kernel,
        out_shape=jax.ShapeDtypeStruct((Beff, Feff), x.dtype),
        grid=grid,
        in_specs=[
            pl.BlockSpec(memory_space=pltpu.MemorySpace.SMEM),    # k scalar
            pl.BlockSpec((TB, TF), lambda b, f: (b, f)),          # x block
            pl.BlockSpec((1, TF), lambda b, f: (0, f)),           # thresh block
        ],
        out_specs=pl.BlockSpec((TB, TF), lambda b, f: (b, f)),
        compiler_params=pltpu.CompilerParams(
            dimension_semantics=("parallel", "parallel"),
            vmem_limit_bytes=vmem_limit,
        ),
    )(k_arr, x2, t2)

    if g is not None:
        return out2.reshape(B, num_rules, num_otus)
    if pad:
        out2 = out2[:, :F]
    return out2.reshape(B, num_rules, num_otus)


if __name__ == "__main__":
    key = jax.random.PRNGKey(0)
    kx, kt, kx2, kt2 = jax.random.split(key, 4)

    # Small shapes consistent with the module: batch=2, num_rules=4, num_otus=16.
    # (num_time_centers only sizes other mditre modules, not Threshold.forward.)
    batch, num_rules, num_otus = 2, 4, 16
    x = jax.random.normal(kx, (batch, num_rules, num_otus), dtype=jnp.float32)
    thresh = jax.random.normal(kt, (num_rules, num_otus), dtype=jnp.float32) * 0.5
    k = 1.0

    # force_pallas=True so the Pallas kernel (fold path: F=64 -> lane width 128)
    # is actually exercised at this small shape.
    out = threshold_forward(x, thresh, k=k, force_pallas=True)
    out = jax.block_until_ready(out)
    ref = jax.nn.sigmoid((x - thresh[None, :, :]) * k)
    assert out.shape == x.shape and out.dtype == x.dtype
    assert jnp.allclose(out, ref, atol=1e-6, rtol=1e-6)

    # Second small case exercising the pad path (F=120, not foldable for B=3)
    # and a non-default k.
    x_b = jax.random.normal(kx2, (3, 5, 24), dtype=jnp.float32)
    thresh_b = jax.random.normal(kt2, (5, 24), dtype=jnp.float32) * 0.5
    out_b = jax.block_until_ready(
        threshold_forward(x_b, thresh_b, k=2.5, force_pallas=True)
    )
    ref_b = jax.nn.sigmoid((x_b - thresh_b[None, :, :]) * 2.5)
    assert jnp.allclose(out_b, ref_b, atol=1e-6, rtol=1e-6)

    print("KERNEL_OK")
</pallas_src>

<mosaic_0001>
module attributes {stable_mosaic.version = 11 : i64} {
  func.func @_threshold_kernel(%arg0: i32, %arg1: i32, %arg2: memref<1x1xf32, #tpu.memory_space<smem>>, %arg3: memref<1x128xf32, #tpu.memory_space<vmem>>, %arg4: memref<1x128xf32, #tpu.memory_space<vmem>>, %arg5: memref<1x128xf32, #tpu.memory_space<vmem>>) attributes {dimension_semantics = [#tpu.dimension_semantics<parallel>, #tpu.dimension_semantics<parallel>], iteration_bounds = array<i64: 1, 1>, scalar_prefetch = 0 : i64, scratch_operands = 0 : i64, tpu.core_type = #tpu.core_type<tc>, window_params = [{transform_indices = @transform_0, window_bounds = array<i64: 1, 1>}, {transform_indices = @transform_1, window_bounds = array<i64: 1, 128>}, {transform_indices = @transform_2, window_bounds = array<i64: 1, 128>}, {transform_indices = @transform_3, window_bounds = array<i64: 1, 128>}]} {
    %c0 = arith.constant 0 : index
    %c0_0 = arith.constant 0 : index
    %0 = memref.load %arg2[%c0, %c0_0] : memref<1x1xf32, #tpu.memory_space<smem>>
    %c0_1 = arith.constant 0 : index
    %c0_2 = arith.constant 0 : index
    %1 = vector.load %arg3[%c0_1, %c0_2] : memref<1x128xf32, #tpu.memory_space<vmem>>, vector<1x128xf32>
    %c0_3 = arith.constant 0 : index
    %c0_4 = arith.constant 0 : index
    %2 = vector.load %arg4[%c0_3, %c0_4] : memref<1x128xf32, #tpu.memory_space<vmem>>, vector<1x128xf32>
    %3 = arith.subf %1, %2 : vector<1x128xf32>
    %4 = vector.broadcast %0 : f32 to vector<1x128xf32>
    %5 = arith.mulf %3, %4 : vector<1x128xf32>
    %6 = arith.negf %5 : vector<1x128xf32>
    %7 = math.exp %6 : vector<1x128xf32>
    %cst = arith.constant 1.000000e+00 : f32
    %8 = vector.broadcast %cst : f32 to vector<1x128xf32>
    %9 = arith.addf %8, %7 : vector<1x128xf32>
    %10 = arith.divf %8, %9 : vector<1x128xf32>
    %c0_5 = arith.constant 0 : index
    %c0_6 = arith.constant 0 : index
    %11 = vector.load %arg5[%c0_5, %c0_6] : memref<1x128xf32, #tpu.memory_space<vmem>>, vector<1x128xf32>
    tpu.vector_store %arg5[%c0_5, %c0_6], %10 {strides = array<i32>} : memref<1x128xf32, #tpu.memory_space<vmem>>, vector<1x128xf32>,
    return
  }
  func.func @transform_0(%arg0: i32, %arg1: i32) -> (i32, i32) {
    %c0_i32 = arith.constant 0 : i32
    %c0_i32_0 = arith.constant 0 : i32
    %c0_i32_1 = arith.constant 0 : i32
    return %c0_i32, %c0_i32_0 : i32, i32
  }
  func.func @transform_1(%arg0: i32, %arg1: i32) -> (i32, i32) {
    %c0_i32 = arith.constant 0 : i32
    return %arg0, %arg1 : i32, i32
  }
  func.func @transform_2(%arg0: i32, %arg1: i32) -> (i32, i32) {
    %c0_i32 = arith.constant 0 : i32
    %c0_i32_0 = arith.constant 0 : i32
    return %c0_i32, %arg1 : i32, i32
  }
  func.func @transform_3(%arg0: i32, %arg1: i32) -> (i32, i32) {
    %c0_i32 = arith.constant 0 : i32
    return %arg0, %arg1 : i32, i32
  }
}

</mosaic_0001>

<bundles_post_ra>
// kernel: tpu_custom_call.1
= control target key start
LH: loop header
LB: loop body
LE: loop exit
PB: predicated region body
PF: predicated region fallthrough
CT: control target
= control target key end

     0   :  { %s104_s0 = inlined_call_operand.<no memory space> [shape: f32[1,1], index: 0, kind: input, shape index: {}]   ;;  %s105_s1 = inlined_call_operand.vmem [shape: f32[1,128], index: 1, kind: input, shape index: {}]   ;;  %s106_s2 = inlined_call_operand.vmem [shape: f32[1,128], index: 2, kind: input, shape index: {}]   ;;  %s107_s3 = inlined_call_operand.hbm [shape: f32[1,128], index: 3, kind: output, shape index: {}]  }
   0x1   :  { %v17_v0 = vld [vmem:[%s105_s1] sm:$0x1]  ;;  %v20_v2 = vstv %s104_s0 }
   0x2   :  { %v18_v1 = vld [vmem:[%s106_s2] sm:$0x1] }
   0x3   :  { %9 = vsyncpa [#allocation4], 0  ;;  %v19_v3 = vsub.f32 %v17_v0, %v18_v1  ;;  %s71_s18 = smov [#allocation3]  }
   0x4   :  { %s35_s19 = sshll.u32 %s71_s18, 4  ;;  %s36_s19 = int_to_ptr.vmem [resolvable:$true] %s35_s19 }
   0x5   :  { %v21_v4 = vmul.f32 %v20_v2, %v19_v3  ;;  %s49_s1 = scalar_lea.vmem %s36_s19, 16  ;;  %s53_s2 = scalar_lea.vmem %s36_s19, 32 }
   0x6   :  { %p50_p0 = scmp.ne.s32.totalorder %s36_s19, %s49_s1  ;;  %p54_p1 = scmp.lt.s32.totalorder %s36_s19, %s36_s19 }
   0x7   :  { %v43_v5 = vmul.f32 -1.442695, %v21_v4  ;;  %p55_p2 = scmp.lt.s32.totalorder %s53_s2, %s49_s1 }
   0x9   :  { %45 = vpow2.f32 %v43_v5  ;;  %p56_p3 = por %p55_p2, %p54_p1 }
   0xb   :  { %p57_p4 = pnand %p56_p3, %p50_p0 }
  0x16   :  { %v46_v6 = vpop.eup %45 }
  0x17   :  { %v25_v7 = vadd.f32 1.0, %v46_v6 }
  0x19   :  { %47 = vrcp.f32 %v25_v7 }
  0x26   :  { %v48_v8 = vpop.eup %47 }
  0x27   :  { %28 = vst [vmem:[#allocation3] sm:$0x1] %v48_v8 }
  0x28   :  { %60 = shalt.err (!%p57_p4)
}
  0x29   :  { %38 = dma.vmem_to_hbm [thread:$0]  %s36_s19, 16, %s107_s3, [#allocation4]  }
  0x2a   :  { %69 = dma.done.wait [#allocation4], 16  }
  0x2b   :  { %70 = vsyncadd [#allocation4], 4294967280 }
  0x2c   :  { %42 = vsyncpa [#allocation4], 1 }

</bundles_post_ra>
